<compile_context>
chip_gen: v7x
topology: tpu7x:2x2x1
jax: 0.10.0
libtpu: 0.0.40
codegen_flags: <defaults>
</compile_context>

<pallas_src>
import functools

import jax
import jax.numpy as jnp
from jax.experimental import pallas as pl
from jax.experimental.pallas import tpu as pltpu


_DST_ALIGN = 16      # sublane alignment safe for both f32 (8) and bf16 (16)
_LANE = 128


def _round_up(x, m):
    return ((x + m - 1) // m) * m


def _pick_tile_d(nd, tile_max=512):
    """Dst-row tile: multiple of 16, prefer >=2 tiles (v7x has 2 TCs) and no pad."""
    nd_al = _round_up(max(nd, 1), _DST_ALIGN)
    if nd_al <= _DST_ALIGN:
        return _DST_ALIGN
    cap = min(tile_max, max(_DST_ALIGN, _round_up((nd_al + 1) // 2, _DST_ALIGN)))
    t = cap
    while t >= max(_DST_ALIGN, cap // 2):
        if nd_al % t == 0:
            return t
        t -= _DST_ALIGN
    return cap


def _pick_tile_s(ns, tile_max=1024):
    """Src-reduction tile: multiple of 128, always divides round_up(ns, 128)."""
    ns_al = _round_up(max(ns, 1), _LANE)
    if ns_al <= tile_max:
        return ns_al
    t = tile_max - (tile_max % _LANE)
    while t >= _LANE:
        if ns_al % t == 0:
            return t
        t -= _LANE
    return _LANE


def _cast_pad(x, rows, cols, dtype):
    """Cast to dtype and zero-pad up to (rows, cols); no-op copy avoided."""
    if x.dtype != dtype:
        x = x.astype(dtype)
    pr, pc = rows - x.shape[0], cols - x.shape[1]
    if pr or pc:
        x = jnp.pad(x, ((0, pr), (0, pc)))
    return x


def _proj_kernel(h_ref, w_ref, o_ref):
    # P = H_src @ W_neigh, hoisted out of the aggregation grid (computed once).
    o_ref[...] = jnp.dot(h_ref[...], w_ref[...],
                         preferred_element_type=jnp.float32).astype(o_ref.dtype)


def _sage_agg_kernel(a_ref, p_ref, hd_ref, ws_ref, b_ref, o_ref, *, apply_relu):
    k = pl.program_id(1)

    @pl.when(k == 0)
    def _init():
        # Self path + bias, once per dst tile.  o_ref is f32 and its block
        # index is constant along k, so it stays VMEM-resident (accumulator).
        o_ref[...] = (jnp.dot(hd_ref[...], ws_ref[...],
                              preferred_element_type=jnp.float32)
                      + b_ref[...])

    # Neighbour path: streamed A tile @ pre-projected P tile.
    o_ref[...] += jnp.dot(a_ref[...], p_ref[...],
                          preferred_element_type=jnp.float32)

    if apply_relu:
        @pl.when(k == pl.num_programs(1) - 1)
        def _relu():
            o_ref[...] = jnp.maximum(o_ref[...], 0.0)


def sage_conv(a_norm, h_src, w_self, w_neigh, bias, *, apply_relu,
              compute_dtype=jnp.bfloat16, tile_d_max=512, tile_s_max=1024):
    """One SAGEConv('mean') layer.  Returns (nd, f_out padded to 128) in f32."""
    nd, ns = a_norm.shape
    f_in = h_src.shape[1]        # may already be lane-padded by previous layer
    f_in_w = w_self.shape[0]     # logical input features of this layer
    f_out = w_self.shape[1]
    assert f_in >= f_in_w

    f_in_pad = _round_up(f_in, _LANE)
    f_out_pad = _round_up(f_out, _LANE)

    tile_d = _pick_tile_d(nd, tile_d_max)
    tile_s = _pick_tile_s(ns, tile_s_max)
    nd_pad = _round_up(nd, tile_d)
    ns_pad = _round_up(max(ns, nd_pad), tile_s)   # dst prefix rows must exist

    a_p = _cast_pad(a_norm, nd_pad, ns_pad, compute_dtype)
    h_p = _cast_pad(h_src, ns_pad, f_in_pad, compute_dtype)
    ws_p = _cast_pad(w_self, f_in_pad, f_out_pad, compute_dtype)
    wn_p = _cast_pad(w_neigh, f_in_pad, f_out_pad, compute_dtype)
    b_p = _cast_pad(bias.reshape(1, f_out), 1, f_out_pad, jnp.float32)

    cparams_1d = pltpu.CompilerParams(
        dimension_semantics=("parallel",),
        vmem_limit_bytes=48 * 1024 * 1024,
    )
    cparams_2d = pltpu.CompilerParams(
        dimension_semantics=("parallel", "arbitrary"),
        vmem_limit_bytes=48 * 1024 * 1024,
    )

    # --- Pass 1: hoisted neighbour projection P = H_src @ W_neigh -----------
    p = pl.pallas_call(
        _proj_kernel,
        out_shape=jax.ShapeDtypeStruct((ns_pad, f_out_pad), compute_dtype),
        grid_spec=pltpu.PrefetchScalarGridSpec(
            num_scalar_prefetch=0,
            grid=(ns_pad // tile_s,),
            in_specs=[
                pl.BlockSpec((tile_s, f_in_pad), lambda i: (i, 0)),      # H_src
                pl.BlockSpec((f_in_pad, f_out_pad), lambda i: (0, 0)),   # W_neigh
            ],
            out_specs=pl.BlockSpec((tile_s, f_out_pad), lambda i: (i, 0)),
        ),
        compiler_params=cparams_1d,
    )(h_p, wn_p)

    # --- Pass 2: o = H_dst @ W_self + bias + A @ P (streamed over src tiles) -
    grid = (nd_pad // tile_d, ns_pad // tile_s)
    kernel = functools.partial(_sage_agg_kernel, apply_relu=apply_relu)

    out = pl.pallas_call(
        kernel,
        out_shape=jax.ShapeDtypeStruct((nd_pad, f_out_pad), jnp.float32),
        grid_spec=pltpu.PrefetchScalarGridSpec(
            num_scalar_prefetch=0,
            grid=grid,
            in_specs=[
                pl.BlockSpec((tile_d, tile_s), lambda i, k: (i, k)),       # A_norm
                pl.BlockSpec((tile_s, f_out_pad), lambda i, k: (k, 0)),    # P (stream)
                pl.BlockSpec((tile_d, f_in_pad), lambda i, k: (i, 0)),     # H_dst prefix
                pl.BlockSpec((f_in_pad, f_out_pad), lambda i, k: (0, 0)),  # W_self (resident)
                pl.BlockSpec((1, f_out_pad), lambda i, k: (0, 0)),         # bias (resident)
            ],
            out_specs=pl.BlockSpec((tile_d, f_out_pad), lambda i, k: (i, 0)),
        ),
        compiler_params=cparams_2d,
    )(a_p, p, h_p, ws_p, b_p)

    # Logical dst rows; keep the feature dim lane-padded for the next layer.
    return out[:nd]


def sage_forward(blocks, x, params, *, compute_dtype=jnp.bfloat16):
    """Mirrors SAGE.forward: loop over (layer, block), ReLU on all but last."""
    h = x
    n_layers = len(params)
    for l, (a_norm, p) in enumerate(zip(blocks, params)):
        h = sage_conv(a_norm, h, p["w_self"], p["w_neigh"], p["bias"],
                      apply_relu=(l != n_layers - 1),
                      compute_dtype=compute_dtype)
    # strip lane padding of the final layer
    return h[:, :params[-1]["bias"].shape[0]]


def _reference(blocks, x, params):
    h = x
    n_layers = len(params)
    for l, (a_norm, p) in enumerate(zip(blocks, params)):
        nd = a_norm.shape[0]
        neigh = a_norm @ h
        h = h[:nd] @ p["w_self"] + neigh @ p["w_neigh"] + p["bias"]
        if l != n_layers - 1:
            h = jnp.maximum(h, 0.0)
    return h


if __name__ == "__main__":
    in_size, hid_size, out_size = 16, 32, 8
    n0, n1, n2 = 64, 32, 16                 # block0 maps n0->n1, block1 maps n1->n2

    key = jax.random.PRNGKey(0)
    kx, ka0, ka1, k1, k2, k3, k4 = jax.random.split(key, 7)

    x = jax.random.normal(kx, (n0, in_size), dtype=jnp.float32)

    def make_block(k, n_dst, n_src):
        adj = (jax.random.uniform(k, (n_dst, n_src)) < 0.3).astype(jnp.float32)
        # guarantee every dst node has at least one in-neighbour
        adj = adj.at[jnp.arange(n_dst), jnp.arange(n_dst)].set(1.0)
        deg = jnp.maximum(adj.sum(axis=1, keepdims=True), 1.0)
        return adj / deg                    # row-normalized -> mean aggregation

    blocks = [make_block(ka0, n1, n0), make_block(ka1, n2, n1)]

    def lin(k, fi, fo):
        return (jax.random.normal(k, (fi, fo), dtype=jnp.float32)
                * (1.0 / jnp.sqrt(jnp.float32(fi))))

    params = [
        {"w_self": lin(k1, in_size, hid_size),
         "w_neigh": lin(k2, in_size, hid_size),
         "bias": jnp.zeros((hid_size,), jnp.float32)},
        {"w_self": lin(k3, hid_size, out_size),
         "w_neigh": lin(k4, hid_size, out_size),
         "bias": jnp.zeros((out_size,), jnp.float32)},
    ]

    ref = _reference(blocks, x, params)

    # Exact-precision path: f32 operands -> tight structural check.
    out_f32 = jax.block_until_ready(
        sage_forward(blocks, x, params, compute_dtype=jnp.float32))
    assert out_f32.shape == (n2, out_size)
    assert bool(jnp.allclose(out_f32, ref, atol=1e-3, rtol=1e-3)), \
        "f32 kernel mismatch vs reference"

    # Default fast path: bf16 streamed operands, f32 accumulation.
    out_bf16 = jax.block_until_ready(sage_forward(blocks, x, params))
    assert out_bf16.shape == (n2, out_size)
    assert bool(jnp.allclose(out_bf16, ref, atol=5e-2, rtol=5e-2)), \
        "bf16 kernel mismatch vs reference"

    print("KERNEL_OK")
</pallas_src>

<mosaic_0001>
module attributes {stable_mosaic.version = 11 : i64} {
  func.func @_proj_kernel(%arg0: i32, %arg1: memref<128x128xf32, #tpu.memory_space<vmem>>, %arg2: memref<128x128xf32, #tpu.memory_space<vmem>>, %arg3: memref<128x128xf32, #tpu.memory_space<vmem>>) attributes {dimension_semantics = [#tpu.dimension_semantics<parallel>], iteration_bounds = array<i64: 1>, scalar_prefetch = 0 : i64, scratch_operands = 0 : i64, tpu.core_type = #tpu.core_type<tc>, window_params = [{transform_indices = @transform_0, window_bounds = array<i64: 128, 128>}, {pipeline_mode = #tpu.pipeline_mode<synchronous>, transform_indices = @transform_1, window_bounds = array<i64: 128, 128>}, {transform_indices = @transform_2, window_bounds = array<i64: 128, 128>}]} {
    %c0 = arith.constant 0 : index
    %c0_0 = arith.constant 0 : index
    %0 = vector.load %arg1[%c0, %c0_0] : memref<128x128xf32, #tpu.memory_space<vmem>>, vector<128x128xf32>
    %c0_1 = arith.constant 0 : index
    %c0_2 = arith.constant 0 : index
    %1 = vector.load %arg2[%c0_1, %c0_2] : memref<128x128xf32, #tpu.memory_space<vmem>>, vector<128x128xf32>
    %cst = arith.constant dense<0.000000e+00> : vector<128x128xf32>
    %2 = tpu.matmul %0, %1, %cst {dimension_numbers = #tpu.dot_dimension_numbers<[1], [0], [0], [1], [0, 0, 1, 1], [], []>} : vector<128x128xf32>, vector<128x128xf32>, vector<128x128xf32> -> vector<128x128xf32>
    %c0_3 = arith.constant 0 : index
    %c0_4 = arith.constant 0 : index
    %3 = vector.load %arg3[%c0_3, %c0_4] : memref<128x128xf32, #tpu.memory_space<vmem>>, vector<128x128xf32>
    tpu.vector_store %arg3[%c0_3, %c0_4], %2 {strides = array<i32>} : memref<128x128xf32, #tpu.memory_space<vmem>>, vector<128x128xf32>,
    return
  }
  func.func @transform_0(%arg0: i32) -> (i32, i32) {
    %c0_i32 = arith.constant 0 : i32
    %c0_i32_0 = arith.constant 0 : i32
    return %arg0, %c0_i32 : i32, i32
  }
  func.func @transform_1(%arg0: i32) -> (i32, i32) {
    %c0_i32 = arith.constant 0 : i32
    %c0_i32_0 = arith.constant 0 : i32
    %c0_i32_1 = arith.constant 0 : i32
    return %c0_i32, %c0_i32_0 : i32, i32
  }
  func.func @transform_2(%arg0: i32) -> (i32, i32) {
    %c0_i32 = arith.constant 0 : i32
    %c0_i32_0 = arith.constant 0 : i32
    return %arg0, %c0_i32 : i32, i32
  }
}

</mosaic_0001>

<bundles_post_ra>
// kernel: tpu_custom_call.1
= control target key start
LH: loop header
LB: loop body
LE: loop exit
PB: predicated region body
PF: predicated region fallthrough
CT: control target
= control target key end

     0   :  { %7 = vsyncpa [#allocation3], 0  ;;  %s529_s0 = inlined_call_operand.hbm [shape: f32[128,128], index: 0, kind: input, shape index: {}]   ;;  %s530_s1 = inlined_call_operand.hbm [shape: f32[128,128], index: 1, kind: input, shape index: {}]   ;;  %s531_s2 = inlined_call_operand.hbm [shape: f32[128,128], index: 2, kind: output, shape index: {}]  }
   0x1   :  { %8 = vsyncpa [#allocation6], 0 }
   0x2   :  { %9 = vsyncpa [#allocation4], 0  ;;  %s464_s9 = smov [#allocation2]   ;;  %s392_s13 = scalar_lea.hbm %s529_s0, 2048 }
   0x3   :  { %s15_s10 = sshll.u32 %s464_s9, 4  ;;  %p393_p0 = scmp.ne.s32.totalorder %s529_s0, %s392_s13  ;;  %s16_s10 = int_to_ptr.vmem [resolvable:$true] %s15_s10 }
   0x4   :  { %p396_p1 = scmp.lt.u32.totalorder %s392_s13, %s529_s0 }
   0x6   :  { %p398_p2 = pnand %p396_p1, %p393_p0 }
   0x8   :  { %401 = shalt.err (!%p398_p2)
}
   0x9   :  { %s402_s18 = scalar_lea.vmem %s16_s10, 2048  ;;  %p407_p4 = scmp.lt.s32.totalorder %s16_s10, %s16_s10 }
   0xa   :  { %p403_p3 = scmp.ne.s32.totalorder %s16_s10, %s402_s18  ;;  %p408_p5 = scmp.lt.s32.totalorder %s402_s18, %s402_s18 }
   0xc   :  { %p409_p6 = por %p408_p5, %p407_p4 }
   0xe   :  { %p410_p7 = pnand %p409_p6, %p403_p3 }
  0x10   :  { %413 = shalt.err (!%p410_p7)
}
  0x11   :  { %s465_s19 = smov 128   ;;  %s466_s20 = smov 8  }
  0x12   :  { %21 = dma.hbm_to_vmem [thread:$0]  %s529_s0, 2048, %s16_s10, [#allocation3], %s465_s19, %s465_s19, %s466_s20  }
  0x13   :  { %s467_s23 = smov [#allocation5]   ;;  %s414_s27 = scalar_lea.hbm %s530_s1, 2048 }
  0x14   :  { %s27_s24 = sshll.u32 %s467_s23, 4  ;;  %p415_p8 = scmp.ne.s32.totalorder %s530_s1, %s414_s27  ;;  %s28_s24 = int_to_ptr.vmem [resolvable:$true] %s27_s24 }
  0x15   :  { %p418_p9 = scmp.lt.u32.totalorder %s414_s27, %s530_s1 }
  0x17   :  { %p420_p10 = pnand %p418_p9, %p415_p8 }
  0x19   :  { %423 = shalt.err (!%p420_p10)
}
  0x1a   :  { %s424_s4 = scalar_lea.vmem %s28_s24, 2048  ;;  %p429_p12 = scmp.lt.s32.totalorder %s28_s24, %s28_s24 }
  0x1b   :  { %p425_p11 = scmp.ne.s32.totalorder %s28_s24, %s424_s4  ;;  %p430_p13 = scmp.lt.s32.totalorder %s424_s4, %s424_s4 }
  0x1d   :  { %p431_p0 = por %p430_p13, %p429_p12 }
  0x1f   :  { %p432_p1 = pnand %p431_p0, %p425_p11 }
  0x21   :  { %435 = shalt.err (!%p432_p1)
}
  0x22   :  { %33 = dma.hbm_to_vmem [thread:$0]  %s530_s1, 2048, %s28_s24, [#allocation6], %s465_s19, %s465_s19, %s466_s20  }
  0x23   :  { %458 = dma.done.wait [#allocation3], 2048  }
  0x24   :  { %459 = vsyncadd [#allocation3], 4294965248 }
  0x25   :  { %460 = dma.done.wait [#allocation6], 2048  }
  0x26   :  { %461 = vsyncadd [#allocation6], 4294965248  ;;  %v56_v0 = vld [vmem:[#allocation5] sm:$0xff]  ;;  %v57_v1 = vld [vmem:[#allocation5 + $0x8] sm:$0xff]  ;;  %s468_s1 = smov [#allocation7]  }
  0x27   :  { %v58_v2 = vld [vmem:[#allocation5 + $0x10] sm:$0xff]  ;;  %v339_v3 = vpack.c.bf16 %v57_v1, %v56_v0  ;;  %v59_v4 = vld [vmem:[#allocation5 + $0x18] sm:$0xff]  ;;  %v60_v6 = vld [vmem:[#allocation5 + $0x20] sm:$0xff]  ;;  %s238_s6 = sshll.u32 %s468_s1, 4  ;;  %s239_s6 = int_to_ptr.vmem [resolvable:$true] %s238_s6 }
  0x28   :  { %v343_v5 = vpack.c.bf16 %v59_v4, %v58_v2  ;;  %v61_v7 = vld [vmem:[#allocation5 + $0x28] sm:$0xff]  ;;  %v40_v9 = vld [vmem:[#allocation2] sm:$0xff]  ;;  %v62_v11 = vld [vmem:[#allocation5 + $0x30] sm:$0xff]  ;;  %s436_s7 = scalar_lea.vmem %s239_s6, 2048  ;;  %p441_p3 = scmp.lt.s32.totalorder %s239_s6, %s239_s6 }
  0x29   :  { %340 = vmatprep.subr.bf16.mxu0 %v339_v3  ;;  %371 = vmatprep.subr.bf16.mxu1 %v339_v3  ;;  %v347_v8 = vpack.c.bf16 %v61_v7, %v60_v6  ;;  %v48_v10 = vld [vmem:[#allocation2 + $0x40] sm:$0xff]  ;;  %v63_v12 = vld [vmem:[#allocation5 + $0x38] sm:$0xff]  ;;  %v65_v15 = vld [vmem:[#allocation5 + $0x48] sm:$0xff]  ;;  %p437_p2 = scmp.ne.s32.totalorder %s239_s6, %s436_s7  ;;  %p442_p4 = scmp.lt.s32.totalorder %s436_s7, %s436_s7 }
  0x2a   :  { %342 = vmatpush3.bf16.msra.mxu0 %v339_v3  ;;  %379 = vmatpush3.bf16.msra.mxu1 %v339_v3  ;;  %v351_v13 = vpack.c.bf16 %v63_v12, %v62_v11  ;;  %v64_v14 = vld [vmem:[#allocation5 + $0x40] sm:$0xff]  ;;  %v66_v17 = vld [vmem:[#allocation5 + $0x50] sm:$0xff]  ;;  %v67_v18 = vld [vmem:[#allocation5 + $0x58] sm:$0xff] }
  0x2b   :  { %344 = vmatprep.subr.bf16.mxu0 %v343_v5  ;;  %372 = vmatprep.subr.bf16.mxu1 %v343_v5  ;;  %v355_v16 = vpack.c.bf16 %v65_v15, %v64_v14  ;;  %v359_v19 = vpack.c.bf16 %v67_v18, %v66_v17  ;;  %v68_v20 = vld [vmem:[#allocation5 + $0x60] sm:$0xff]  ;;  %v69_v21 = vld [vmem:[#allocation5 + $0x68] sm:$0xff]  ;;  %v70_v23 = vld [vmem:[#allocation5 + $0x70] sm:$0xff]  ;;  %p443_p5 = por %p442_p4, %p441_p3 }
  0x2c   :  { %315 = vmatprep.mubr.f32.mxu0 %v40_v9  ;;  %327 = vmatprep.mubr.f32.mxu1 %v48_v10  ;;  %v363_v22 = vpack.c.bf16 %v69_v21, %v68_v20  ;;  %v71_v24 = vld [vmem:[#allocation5 + $0x78] sm:$0xff]  ;;  %v41_v26 = vld [vmem:[#allocation2 + $0x8] sm:$0xff]  ;;  %v42_v28 = vld [vmem:[#allocation2 + $0x10] sm:$0xff] }
  0x2d   :  { %v367_v25 = vpack.c.bf16 %v71_v24, %v70_v23  ;;  %v49_v27 = vld [vmem:[#allocation2 + $0x48] sm:$0xff]  ;;  %v50_v29 = vld [vmem:[#allocation2 + $0x50] sm:$0xff]  ;;  %v43_v30 = vld [vmem:[#allocation2 + $0x18] sm:$0xff]  ;;  %p444_p6 = pnand %p443_p5, %p437_p2 }
  0x2e   :  { %346 = vmatpush3.bf16.msra.mxu0 %v343_v5  ;;  %380 = vmatpush3.bf16.msra.mxu1 %v343_v5  ;;  %v51_v31 = vld [vmem:[#allocation2 + $0x58] sm:$0xff]  ;;  %v44_v32 = vld [vmem:[#allocation2 + $0x20] sm:$0xff]  ;;  %v45_v34 = vld [vmem:[#allocation2 + $0x28] sm:$0xff] }
  0x2f   :  { %348 = vmatprep.subr.bf16.mxu0 %v347_v8  ;;  %373 = vmatprep.subr.bf16.mxu1 %v347_v8  ;;  %v52_v33 = vld [vmem:[#allocation2 + $0x60] sm:$0xff]  ;;  %v53_v35 = vld [vmem:[#allocation2 + $0x68] sm:$0xff]  ;;  %v46_v36 = vld [vmem:[#allocation2 + $0x30] sm:$0xff] }
  0x30   :  { %v54_v37 = vld [vmem:[#allocation2 + $0x70] sm:$0xff]  ;;  %v47_v38 = vld [vmem:[#allocation2 + $0x38] sm:$0xff] }
  0x31   :  { %v55_v39 = vld [vmem:[#allocation2 + $0x78] sm:$0xff] }
  0x32   :  { %350 = vmatpush3.bf16.msra.mxu0 %v347_v8  ;;  %381 = vmatpush3.bf16.msra.mxu1 %v347_v8 }
  0x33   :  { %352 = vmatprep.subr.bf16.mxu0 %v351_v13  ;;  %374 = vmatprep.subr.bf16.mxu1 %v351_v13 }
  0x36   :  { %354 = vmatpush3.bf16.msra.mxu0 %v351_v13  ;;  %382 = vmatpush3.bf16.msra.mxu1 %v351_v13 }
  0x37   :  { %356 = vmatprep.subr.bf16.mxu0 %v355_v16  ;;  %375 = vmatprep.subr.bf16.mxu1 %v355_v16 }
  0x3a   :  { %358 = vmatpush3.bf16.msra.mxu0 %v355_v16  ;;  %383 = vmatpush3.bf16.msra.mxu1 %v355_v16 }
  0x3b   :  { %360 = vmatprep.subr.bf16.mxu0 %v359_v19  ;;  %376 = vmatprep.subr.bf16.mxu1 %v359_v19 }
  0x3e   :  { %362 = vmatpush3.bf16.msra.mxu0 %v359_v19  ;;  %384 = vmatpush3.bf16.msra.mxu1 %v359_v19 }
  0x3f   :  { %364 = vmatprep.subr.bf16.mxu0 %v363_v22  ;;  %377 = vmatprep.subr.bf16.mxu1 %v363_v22 }
  0x42   :  { %366 = vmatpush3.bf16.msra.mxu0 %v363_v22  ;;  %385 = vmatpush3.bf16.msra.mxu1 %v363_v22 }
  0x43   :  { %368 = vmatprep.subr.bf16.mxu0 %v367_v25  ;;  %378 = vmatprep.subr.bf16.mxu1 %v367_v25 }
  0x46   :  { %370 = vmatpush3.bf16.msra.mxu0 %v367_v25  ;;  %386 = vmatpush3.bf16.msra.mxu1 %v367_v25 }
  0x49   :  { %316 = vmatmul.mubr.f32.vlgmr.msra.gmra.mrb[0].mxu0 %v41_v26  ;;  %328 = vmatmul.mubr.f32.vlgmr.msra.gmra.mrb[0].mxu1 %v49_v27 }
  0x4a   :  { %318 = vmatprep.mubr.f32.mxu0 %v42_v28  ;;  %330 = vmatprep.mubr.f32.mxu1 %v50_v29 }
  0x4d   :  { %319 = vmatmul.mubr.f32.gmra.mrb[2].mxu0 %v43_v30  ;;  %331 = vmatmul.mubr.f32.gmra.mrb[2].mxu1 %v51_v31 }
  0x4e   :  { %321 = vmatprep.mubr.f32.mxu0 %v44_v32  ;;  %333 = vmatprep.mubr.f32.mxu1 %v52_v33 }
  0x51   :  { %322 = vmatmul.mubr.f32.gmra.mrb[4].mxu0 %v45_v34  ;;  %334 = vmatmul.mubr.f32.gmra.mrb[4].mxu1 %v53_v35 }
  0x52   :  { %324 = vmatprep.mubr.f32.mxu0 %v46_v36  ;;  %336 = vmatprep.mubr.f32.mxu1 %v54_v37 }
  0x55   :  { %325 = vmatmul.mubr.f32.gmra.mrb[6].mxu0 %v47_v38  ;;  %337 = vmatmul.mubr.f32.gmra.mrb[6].mxu1 %v55_v39 }
 0x11c   :  { %v317_v40 = vpop.f32.mrb[0].mxu0  ;;  %v329_v41 = vpop.f32.mrb[0].mxu1 }
 0x11d   :  { %218 = vst [vmem:[#allocation7 + $0x8] sm:$0xff] %v317_v40  ;;  %226 = vst [vmem:[#allocation7 + $0x48] sm:$0xff] %v329_v41  ;;  %v138_v42 = vpop.f32.mrb[1].mxu0  ;;  %v178_v43 = vpop.f32.mrb[1].mxu1 }
 0x11e   :  { %217 = vst [vmem:[#allocation7] sm:$0xff] %v138_v42  ;;  %225 = vst [vmem:[#allocation7 + $0x40] sm:$0xff] %v178_v43 }
 0x120   :  { %v320_v44 = vpop.f32.mrb[2].mxu0  ;;  %v332_v45 = vpop.f32.mrb[2].mxu1 }
 0x121   :  { %220 = vst [vmem:[#allocation7 + $0x18] sm:$0xff] %v320_v44  ;;  %228 = vst [vmem:[#allocation7 + $0x58] sm:$0xff] %v332_v45  ;;  %v148_v46 = vpop.f32.mrb[3].mxu0  ;;  %v188_v47 = vpop.f32.mrb[3].mxu1 }
 0x122   :  { %219 = vst [vmem:[#allocation7 + $0x10] sm:$0xff] %v148_v46  ;;  %227 = vst [vmem:[#allocation7 + $0x50] sm:$0xff] %v188_v47 }
 0x124   :  { %v323_v48 = vpop.f32.mrb[4].mxu0  ;;  %v335_v49 = vpop.f32.mrb[4].mxu1 }
 0x125   :  { %222 = vst [vmem:[#allocation7 + $0x28] sm:$0xff] %v323_v48  ;;  %230 = vst [vmem:[#allocation7 + $0x68] sm:$0xff] %v335_v49  ;;  %v158_v50 = vpop.f32.mrb[5].mxu0  ;;  %v198_v51 = vpop.f32.mrb[5].mxu1 }
 0x126   :  { %221 = vst [vmem:[#allocation7 + $0x20] sm:$0xff] %v158_v50  ;;  %229 = vst [vmem:[#allocation7 + $0x60] sm:$0xff] %v198_v51 }
 0x128   :  { %v326_v52 = vpop.f32.mrb[6].mxu0  ;;  %v338_v53 = vpop.f32.mrb[6].mxu1 }
 0x129   :  { %224 = vst [vmem:[#allocation7 + $0x38] sm:$0xff] %v326_v52  ;;  %232 = vst [vmem:[#allocation7 + $0x78] sm:$0xff] %v338_v53  ;;  %v168_v54 = vpop.f32.mrb[7].mxu0  ;;  %v208_v55 = vpop.f32.mrb[7].mxu1 }
 0x12a   :  { %223 = vst [vmem:[#allocation7 + $0x30] sm:$0xff] %v168_v54  ;;  %231 = vst [vmem:[#allocation7 + $0x70] sm:$0xff] %v208_v55 }
 0x12b   :  { %447 = shalt.err (!%p444_p6)
}
 0x12c   :  { %s448_s10 = scalar_lea.hbm %s531_s2, 2048 }
 0x12d   :  { %p449_p7 = scmp.ne.s32.totalorder %s531_s2, %s448_s10  ;;  %p452_p8 = scmp.lt.u32.totalorder %s448_s10, %s531_s2 }
 0x12f   :  { %p454_p9 = pnand %p452_p8, %p449_p7 }
 0x131   :  { %457 = shalt.err (!%p454_p9)
}
 0x132   :  { %244 = dma.vmem_to_hbm [thread:$0]  %s239_s6, 2048, %s531_s2, [#allocation4], %s465_s19, %s465_s19, %s466_s20  }
 0x133   :  { %462 = dma.done.wait [#allocation4], 2048  }
 0x134   :  { %463 = vsyncadd [#allocation4], 4294965248 }
 0x135   :  { %248 = vsyncpa [#allocation3], 1 }
 0x136   :  { %249 = vsyncpa [#allocation6], 1 }
 0x137   :  { %250 = vsyncpa [#allocation4], 1 }

</bundles_post_ra>
